<compile_context>
chip_gen: v7x
topology: tpu7x:2x2x1
jax: 0.10.0
libtpu: 0.0.40
codegen_flags: <defaults>
</compile_context>

<pallas_src>
import math

import numpy as np
import jax
import jax.numpy as jnp
from jax.experimental import pallas as pl
from jax.experimental.pallas import tpu as pltpu


def _pos_enc_kernel(beta_ref, beta_dims_ref, pe_row_ref, out_ref):
    # The data-dependent row gather already happened in the index_map (scalar
    # prefetch); the body just moves the resident (1, 1, d_model) row to out.
    del beta_ref, beta_dims_ref
    out_ref[...] = pe_row_ref[0]
    # TODO(synk): nn.Dropout is identity at inference; train-mode RNG dropout
    # (pltpu.prng_seed + prng_random_bits + mask/scale) not emitted here.


def make_pe_table(d_model: int, max_len: int) -> jnp.ndarray:
    """Deterministic pe buffer, same formula/shape as the PyTorch __init__:
    (max_len, 1, d_model)."""
    position = jnp.arange(max_len, dtype=jnp.float32)[:, None]
    div_term = jnp.exp(
        jnp.arange(0, d_model, 2, dtype=jnp.float32) * (-math.log(10000.0) / d_model)
    )
    angles = position * div_term
    pe = jnp.zeros((max_len, d_model), jnp.float32)
    pe = pe.at[:, 0::2].set(jnp.sin(angles))
    pe = pe.at[:, 1::2].set(jnp.cos(angles))
    return pe.reshape(max_len, 1, d_model)


def positional_encoding_forward(beta: jnp.ndarray,
                                beta_dims: jnp.ndarray,
                                pe: jnp.ndarray) -> jnp.ndarray:
    """Returns pe[dot(beta, beta_dims)] with shape (1, d_model)."""
    max_len, _, d_model = pe.shape

    # Scalar-prefetch operands must be int32 scalars living in SMEM.
    beta = beta.astype(jnp.int32)
    beta_dims = beta_dims.astype(jnp.int32)
    k = beta.shape[0]

    def pe_index_map(i, beta_ref, beta_dims_ref):
        # idx = dot(beta, beta_dims): tiny static K -> unrolled SMEM scalar ops.
        idx = beta_ref[0] * beta_dims_ref[0]
        for t in range(1, k):
            idx = idx + beta_ref[t] * beta_dims_ref[t]
        # Guard the data-dependent DMA (no runtime OOB check on TPU).
        idx = jnp.minimum(jnp.maximum(idx, 0), max_len - 1)
        return (idx, 0, 0)

    grid_spec = pltpu.PrefetchScalarGridSpec(
        num_scalar_prefetch=2,          # beta, beta_dims land in SMEM pre-grid
        grid=(1,),
        in_specs=[
            # Only one row of pe is ever moved HBM -> VMEM.
            pl.BlockSpec((1, 1, d_model), pe_index_map),
        ],
        out_specs=pl.BlockSpec((1, d_model),
                               lambda i, beta_ref, beta_dims_ref: (0, 0)),
    )

    return pl.pallas_call(
        _pos_enc_kernel,
        out_shape=jax.ShapeDtypeStruct((1, d_model), jnp.float32),
        grid_spec=grid_spec,
        compiler_params=pltpu.CompilerParams(
            dimension_semantics=("arbitrary",)),
    )(beta, beta_dims, pe)


if __name__ == "__main__":
    # Small, module-consistent shapes.
    d_model = 32
    beta_dims = jnp.array([2, 3, 4], dtype=jnp.int32)        # max_len = prod = 24
    max_len = int(np.prod(np.asarray(beta_dims)))

    pe = make_pe_table(d_model, max_len)                      # (24, 1, 32)

    # Deterministic input; values chosen so dot(beta, beta_dims) < max_len.
    key = jax.random.PRNGKey(0)
    beta = jax.random.randint(key, (3,), 0, 2, dtype=jnp.int32)

    out = positional_encoding_forward(beta, beta_dims, pe)
    out = jax.block_until_ready(out)

    # Pure-JAX reference of the forward pass (dropout == identity at inference).
    idx_ref = int(jnp.dot(beta, beta_dims))
    ref = np.asarray(pe)[idx_ref]                             # (1, d_model)

    np.testing.assert_allclose(np.asarray(out), ref, rtol=1e-6, atol=1e-6)
    assert out.shape == (1, d_model) and out.dtype == jnp.float32
    print("KERNEL_OK")
</pallas_src>

<mosaic_0001>
module attributes {stable_mosaic.version = 11 : i64} {
  func.func @_pos_enc_kernel(%arg0: i32, %arg1: memref<3xi32, #tpu.memory_space<smem>>, %arg2: memref<3xi32, #tpu.memory_space<smem>>, %arg3: memref<1x1x32xf32, #tpu.memory_space<vmem>>, %arg4: memref<1x32xf32, #tpu.memory_space<vmem>>) attributes {dimension_semantics = [#tpu.dimension_semantics<arbitrary>], iteration_bounds = array<i64: 1>, scalar_prefetch = 2 : i64, scratch_operands = 0 : i64, tpu.core_type = #tpu.core_type<tc>, window_params = [{transform_indices = @transform_0, window_bounds = array<i64: 1, 1, 32>}, {pipeline_mode = #tpu.pipeline_mode<synchronous>, transform_indices = @transform_1, window_bounds = array<i64: 1, 32>}]} {
    %c0 = arith.constant 0 : index
    %c0_0 = arith.constant 0 : index
    %c0_1 = arith.constant 0 : index
    %0 = vector.load %arg3[%c0, %c0_0, %c0_1] : memref<1x1x32xf32, #tpu.memory_space<vmem>>, vector<1x1x32xf32>
    %1 = vector.shape_cast %0 : vector<1x1x32xf32> to vector<1x32xf32>
    %c0_2 = arith.constant 0 : index
    %c0_3 = arith.constant 0 : index
    %2 = vector.load %arg4[%c0_2, %c0_3] : memref<1x32xf32, #tpu.memory_space<vmem>>, vector<1x32xf32>
    tpu.vector_store %arg4[%c0_2, %c0_3], %1 {strides = array<i32>} : memref<1x32xf32, #tpu.memory_space<vmem>>, vector<1x32xf32>,
    return
  }
  func.func @transform_0(%arg0: i32, %arg1: memref<3xi32, #tpu.memory_space<smem>>, %arg2: memref<3xi32, #tpu.memory_space<smem>>) -> (i32, i32, i32) {
    %c0 = arith.constant 0 : index
    %0 = memref.load %arg1[%c0] : memref<3xi32, #tpu.memory_space<smem>>
    %c0_0 = arith.constant 0 : index
    %1 = memref.load %arg2[%c0_0] : memref<3xi32, #tpu.memory_space<smem>>
    %2 = arith.muli %0, %1 : i32
    %c1 = arith.constant 1 : index
    %3 = memref.load %arg1[%c1] : memref<3xi32, #tpu.memory_space<smem>>
    %c1_1 = arith.constant 1 : index
    %4 = memref.load %arg2[%c1_1] : memref<3xi32, #tpu.memory_space<smem>>
    %5 = arith.muli %3, %4 : i32
    %6 = arith.addi %2, %5 : i32
    %c2 = arith.constant 2 : index
    %7 = memref.load %arg1[%c2] : memref<3xi32, #tpu.memory_space<smem>>
    %c2_2 = arith.constant 2 : index
    %8 = memref.load %arg2[%c2_2] : memref<3xi32, #tpu.memory_space<smem>>
    %9 = arith.muli %7, %8 : i32
    %10 = arith.addi %6, %9 : i32
    %c0_i32 = arith.constant 0 : i32
    %11 = arith.maxsi %10, %c0_i32 : i32
    %c23_i32 = arith.constant 23 : i32
    %12 = arith.minsi %11, %c23_i32 : i32
    %c0_i32_3 = arith.constant 0 : i32
    %c0_i32_4 = arith.constant 0 : i32
    %c0_i32_5 = arith.constant 0 : i32
    return %12, %c0_i32_3, %c0_i32_4 : i32, i32, i32
  }
  func.func @transform_1(%arg0: i32, %arg1: memref<3xi32, #tpu.memory_space<smem>>, %arg2: memref<3xi32, #tpu.memory_space<smem>>) -> (i32, i32) {
    %c0_i32 = arith.constant 0 : i32
    %c0_i32_0 = arith.constant 0 : i32
    %c0_i32_1 = arith.constant 0 : i32
    return %c0_i32, %c0_i32_0 : i32, i32
  }
}

</mosaic_0001>

<bundles_post_ra>
// kernel: tpu_custom_call.1
= control target key start
LH: loop header
LB: loop body
LE: loop exit
PB: predicated region body
PF: predicated region fallthrough
CT: control target
= control target key end

     0   :  { %s233_s0 = inlined_call_operand.hbm [shape: s32[3], index: 0, kind: input, shape index: {}]   ;;  %s234_s2 = inlined_call_operand.hbm [shape: f32[24,1,32], index: 2, kind: input, shape index: {}]   ;;  %s235_s3 = inlined_call_operand.hbm [shape: f32[1,32], index: 3, kind: output, shape index: {}]   ;;  %s236_s1 = inlined_call_operand.vmem [shape: s32[3], index: 1, kind: input, shape index: {}]  }
   0x1   :  { %s99_s14 = scalar_lea.hbm %s233_s0, 16 }
   0x2   :  { %p100_p0 = scmp.ne.s32.totalorder %s233_s0, %s99_s14  ;;  %p103_p1 = scmp.lt.u32.totalorder %s99_s14, %s233_s0 }
   0x4   :  { %p105_p2 = pnand %p103_p1, %p100_p0 }
   0x6   :  { %108 = shalt.err (!%p105_p2)  }
   0x7   :  { %s173_s19 = smov [#allocation3]   ;;  %s10_s24 = sshll.u32 %s236_s1, 4  ;;  %s11_s24 = int_to_ptr.vmem [resolvable:$true] %s10_s24 }
   0x8   :  { %9 = dma.hbm_to_smem %s233_s0, 16, %s173_s19, [#allocation2] }
   0x9   :  { %s109_s25 = scalar_lea.vmem %s11_s24, 16  ;;  %p114_p4 = scmp.lt.s32.totalorder %s11_s24, %s11_s24 }
   0xa   :  { %p110_p3 = scmp.ne.s32.totalorder %s11_s24, %s109_s25  ;;  %p115_p5 = scmp.lt.s32.totalorder %s109_s25, %s109_s25 }
   0xc   :  { %p116_p6 = por %p115_p5, %p114_p4 }
   0xe   :  { %p117_p7 = pnand %p116_p6, %p110_p3 }
  0x10   :  { %120 = shalt.err (!%p117_p7)  }
  0x11   :  { %s174_s26 = smov [#allocation4]  }
  0x12   :  { %13 = dma.vmem_to_smem %s11_s24, 16, %s174_s26, [#allocation2] }
  0x13   :  { %167 = dma.done.wait [#allocation2], 32 }
  0x14   :  { %168 = vsyncadd [#allocation2], 4294967264 }
  0x15   :  { %15 = sfence }
  0x16   :  { %16 = vsyncpa [#allocation6], 0 }
  0x17   :  { %17 = vsyncpa [#allocation7], 0  ;;  %s20_s0 = sld [smem:[#allocation3]]  ;;  %s83_s28 = sld [smem:[#allocation3 + $0x1]] }
  0x18   :  { %s21_s27 = sld [smem:[#allocation4]]  ;;  %s84_s29 = sld [smem:[#allocation4 + $0x1]] }
  0x19   :  { %s85_s1 = sld [smem:[#allocation3 + $0x2]]  ;;  %s175_s9 = smov [#allocation5]  }
  0x1a   :  { %s86_s30 = sld [smem:[#allocation4 + $0x2]]  ;;  %s41_s10 = sshll.u32 %s175_s9, 4  ;;  %s42_s10 = int_to_ptr.vmem [resolvable:$true] %s41_s10 }
  0x1b   :  { %s123_s18 = scalar_lea.hbm %s234_s2, 384 }
  0x1e   :  { %s22_s4 = smul.u32 %s21_s27, %s20_s0 }
  0x1f   :  { %s25_s5 = smul.u32 %s84_s29, %s83_s28 }
  0x20   :  { %s29_s6 = smul.u32 %s86_s30, %s85_s1 }
  0x21   :  { %s26_s7 = sadd.s32 %s25_s5, %s22_s4 }
  0x22   :  { %s30_s8 = sadd.s32 %s29_s6, %s26_s7 }
  0x23   :  { %p31_p8 = scmp.gt.s32.totalorder %s30_s8, 0  ;;  %p87_p9 = scmp.lt.s32.totalorder %s30_s8, 23 }
  0x25   :  { %s238_s8 = smov (!%p31_p8, %s30_s8), 0 }
  0x26   :  { %s240_s8 = smov (!%p87_p9, %s238_s8), 23 }
  0x27   :  { %s92_s11 = sshll.u32 %s240_s8, 4 }
  0x28   :  { %s39_s14 = scalar_lea.hbm %s234_s2, %s92_s11 }
  0x29   :  { %s121_s15 = scalar_lea.hbm %s39_s14, 16  ;;  %p124_p11 = scmp.lt.u32.totalorder %s39_s14, %s234_s2 }
  0x2a   :  { %p122_p10 = scmp.ne.s32.totalorder %s39_s14, %s121_s15  ;;  %p125_p12 = scmp.lt.u32.totalorder %s123_s18, %s121_s15 }
  0x2b   :  { %p127_p0 = scmp.lt.u32.totalorder %s121_s15, %s39_s14 }
  0x2c   :  { %p126_p13 = por %p125_p12, %p124_p11 }
  0x2e   :  { %p128_p1 = por %p127_p0, %p126_p13 }
  0x30   :  { %p129_p2 = pnand %p128_p1, %p122_p10 }
  0x32   :  { %132 = shalt.err (!%p129_p2)
}
  0x33   :  { %s133_s21 = scalar_lea.vmem %s42_s10, 16  ;;  %s137_s22 = scalar_lea.vmem %s42_s10, 32 }
  0x34   :  { %p134_p3 = scmp.ne.s32.totalorder %s42_s10, %s133_s21  ;;  %p138_p4 = scmp.lt.s32.totalorder %s42_s10, %s42_s10 }
  0x35   :  { %p139_p5 = scmp.lt.s32.totalorder %s137_s22, %s133_s21 }
  0x37   :  { %p140_p6 = por %p139_p5, %p138_p4 }
  0x39   :  { %p141_p7 = pnand %p140_p6, %p134_p3 }
  0x3b   :  { %144 = shalt.err (!%p141_p7)
}
  0x3c   :  { %44 = dma.hbm_to_vmem [thread:$0]  %s39_s14, 16, %s42_s10, [#allocation6]  }
  0x3d   :  { %169 = dma.done.wait [#allocation6], 16  }
  0x3e   :  { %170 = vsyncadd [#allocation6], 4294967280  ;;  %s176_s23 = smov [#allocation8]   ;;  %vm64_vm0 = vcmask 253952   ;;  %v63_v0 = vld [vmem:[#allocation5] sm:$0x1] }
  0x3f   :  { %s72_s24 = sshll.u32 %s176_s23, 4  ;;  %65 = vst.msk [vmem:[#allocation8] sm:$0x1] %vm64_vm0, %v63_v0  ;;  %s73_s24 = int_to_ptr.vmem [resolvable:$true] %s72_s24 }
  0x40   :  { %s145_s2 = scalar_lea.vmem %s73_s24, 16  ;;  %s149_s25 = scalar_lea.vmem %s73_s24, 32 }
  0x41   :  { %p146_p8 = scmp.ne.s32.totalorder %s73_s24, %s145_s2  ;;  %p150_p9 = scmp.lt.s32.totalorder %s73_s24, %s73_s24 }
  0x42   :  { %p151_p10 = scmp.lt.s32.totalorder %s149_s25, %s145_s2 }
  0x44   :  { %p152_p11 = por %p151_p10, %p150_p9 }
  0x46   :  { %p153_p12 = pnand %p152_p11, %p146_p8 }
  0x48   :  { %156 = shalt.err (!%p153_p12)
}
  0x49   :  { %s157_s27 = scalar_lea.hbm %s235_s3, 16 }
  0x4a   :  { %p158_p13 = scmp.ne.s32.totalorder %s235_s3, %s157_s27  ;;  %p161_p0 = scmp.lt.u32.totalorder %s157_s27, %s235_s3 }
  0x4c   :  { %p163_p1 = pnand %p161_p0, %p158_p13 }
  0x4e   :  { %166 = shalt.err (!%p163_p1)
}
  0x4f   :  { %75 = dma.vmem_to_hbm [thread:$0]  %s73_s24, 16, %s235_s3, [#allocation7]  }
  0x50   :  { %171 = dma.done.wait [#allocation7], 16  }
  0x51   :  { %172 = vsyncadd [#allocation7], 4294967280 }
  0x52   :  { %79 = vsyncpa [#allocation6], 1 }
  0x53   :  { %80 = vsyncpa [#allocation7], 1 }

</bundles_post_ra>
